<compile_context>
chip_gen: v7x
topology: tpu7x:2x2x1
jax: 0.10.0
libtpu: 0.0.40
codegen_flags: <defaults>
</compile_context>

<pallas_src>
import jax
import jax.numpy as jnp
from jax.experimental import pallas as pl
from jax.experimental.pallas import tpu as pltpu


def _linreg_kernel(w_ref, b_ref, x_ref, o_ref):
    # w_ref, b_ref: shape-(1,) scalars in SMEM; x_ref/o_ref: (TILE_ROWS, N) VMEM tiles.
    w = w_ref[0]
    b = b_ref[0]
    o_ref[...] = w * x_ref[...] + b


# Cap each block at ~4 MiB: double-buffered input + output => ~16 MiB VMEM,
# comfortably inside the default scoped limit on v5e/v6e/v7x.
_MAX_BLOCK_BYTES = 4 * 1024 * 1024


def linear_regression_forward(x: jax.Array, weights: jax.Array, bias: jax.Array) -> jax.Array:
    """Computes weights * x + bias elementwise (weights, bias are shape-(1,) arrays)."""
    assert weights.shape == (1,) and bias.shape == (1,)

    orig_shape = x.shape
    # Flatten to 2D (rows, lanes): last dim stays on the lane axis (lane-dense
    # loads AND stores -> unmasked vst), everything else becomes rows.
    if x.ndim <= 1:
        x2 = x.reshape(1, -1)
    else:
        x2 = x.reshape(-1, x.shape[-1])
    M, N = x2.shape

    # Pick the row-tile: as many rows as fit the block-byte budget, kept
    # sublane-aligned (multiple of 8) unless the block covers the whole array.
    bytes_per_row = N * x2.dtype.itemsize
    rows_fit = max(1, _MAX_BLOCK_BYTES // max(bytes_per_row, 1))
    tile_rows = min(M, rows_fit)
    if tile_rows < M:
        tile_rows = max(8, (tile_rows // 8) * 8)

    grid = (pl.cdiv(M, tile_rows),)

    out2 = pl.pallas_call(
        _linreg_kernel,
        out_shape=jax.ShapeDtypeStruct((M, N), x2.dtype),
        grid=grid,
        in_specs=[
            pl.BlockSpec(memory_space=pltpu.SMEM),          # weights (scalar)
            pl.BlockSpec(memory_space=pltpu.SMEM),          # bias (scalar)
            pl.BlockSpec((tile_rows, N), lambda i: (i, 0)),  # x tile (lane-dense)
        ],
        out_specs=pl.BlockSpec((tile_rows, N), lambda i: (i, 0)),
        compiler_params=pltpu.CompilerParams(
            # Embarrassingly parallel stream: lets v7x shard the grid across
            # its 2 TensorCores; no-op on single-TC v5e/v6e.
            dimension_semantics=("parallel",),
        ),
    )(weights, bias, x2)

    return out2.reshape(orig_shape)


if __name__ == "__main__":
    key = jax.random.PRNGKey(0)
    kx, kw, kb = jax.random.split(key, 3)

    # Deterministic "parameters" (matching torch.randn(1) shapes).
    weights = jax.random.normal(kw, (1,), dtype=jnp.float32)
    bias = jax.random.normal(kb, (1,), dtype=jnp.float32)

    # Small example input (rows x lanes); last dim a multiple of 128.
    x = jax.random.normal(kx, (16, 256), dtype=jnp.float32)

    y = linear_regression_forward(x, weights, bias)
    y = jax.block_until_ready(y)

    # Reference check in plain JAX.
    y_ref = weights[0] * x + bias[0]
    assert y.shape == x.shape and y.dtype == x.dtype
    assert jnp.allclose(y, y_ref, atol=1e-6), "mismatch vs reference"

    print("KERNEL_OK")
</pallas_src>

<mosaic_0001>
module attributes {stable_mosaic.version = 11 : i64} {
  func.func @_linreg_kernel(%arg0: i32, %arg1: memref<1xf32, #tpu.memory_space<smem>>, %arg2: memref<1xf32, #tpu.memory_space<smem>>, %arg3: memref<16x256xf32, #tpu.memory_space<vmem>>, %arg4: memref<16x256xf32, #tpu.memory_space<vmem>>) attributes {dimension_semantics = [#tpu.dimension_semantics<parallel>], iteration_bounds = array<i64: 1>, scalar_prefetch = 0 : i64, scratch_operands = 0 : i64, tpu.core_type = #tpu.core_type<tc>, window_params = [{transform_indices = @transform_0, window_bounds = array<i64: 1>}, {transform_indices = @transform_1, window_bounds = array<i64: 1>}, {transform_indices = @transform_2, window_bounds = array<i64: 16, 256>}, {transform_indices = @transform_3, window_bounds = array<i64: 16, 256>}]} {
    %c0 = arith.constant 0 : index
    %0 = memref.load %arg1[%c0] : memref<1xf32, #tpu.memory_space<smem>>
    %c0_0 = arith.constant 0 : index
    %1 = memref.load %arg2[%c0_0] : memref<1xf32, #tpu.memory_space<smem>>
    %c0_1 = arith.constant 0 : index
    %c0_2 = arith.constant 0 : index
    %2 = vector.load %arg3[%c0_1, %c0_2] : memref<16x256xf32, #tpu.memory_space<vmem>>, vector<16x256xf32>
    %3 = vector.broadcast %0 : f32 to vector<16x256xf32>
    %4 = arith.mulf %3, %2 : vector<16x256xf32>
    %5 = vector.broadcast %1 : f32 to vector<16x256xf32>
    %6 = arith.addf %4, %5 : vector<16x256xf32>
    %c0_3 = arith.constant 0 : index
    %c0_4 = arith.constant 0 : index
    %7 = vector.load %arg4[%c0_3, %c0_4] : memref<16x256xf32, #tpu.memory_space<vmem>>, vector<16x256xf32>
    tpu.vector_store %arg4[%c0_3, %c0_4], %6 {strides = array<i32>} : memref<16x256xf32, #tpu.memory_space<vmem>>, vector<16x256xf32>,
    return
  }
  func.func @transform_0(%arg0: i32) -> i32 {
    %c0_i32 = arith.constant 0 : i32
    %c0_i32_0 = arith.constant 0 : i32
    return %c0_i32 : i32
  }
  func.func @transform_1(%arg0: i32) -> i32 {
    %c0_i32 = arith.constant 0 : i32
    %c0_i32_0 = arith.constant 0 : i32
    return %c0_i32 : i32
  }
  func.func @transform_2(%arg0: i32) -> (i32, i32) {
    %c0_i32 = arith.constant 0 : i32
    %c0_i32_0 = arith.constant 0 : i32
    return %arg0, %c0_i32 : i32, i32
  }
  func.func @transform_3(%arg0: i32) -> (i32, i32) {
    %c0_i32 = arith.constant 0 : i32
    %c0_i32_0 = arith.constant 0 : i32
    return %arg0, %c0_i32 : i32, i32
  }
}

</mosaic_0001>

<bundles_post_ra>
// kernel: tpu_custom_call.1
= control target key start
LH: loop header
LB: loop body
LE: loop exit
PB: predicated region body
PF: predicated region fallthrough
CT: control target
= control target key end

     0   :  { %10 = vsyncpa [#allocation5], 0  ;;  %s180_s0 = inlined_call_operand.<no memory space> [shape: f32[1], index: 0, kind: input, shape index: {}]   ;;  %s181_s1 = inlined_call_operand.<no memory space> [shape: f32[1], index: 1, kind: input, shape index: {}]   ;;  %s182_s2 = inlined_call_operand.hbm [shape: f32[16,256], index: 2, kind: input, shape index: {}]   ;;  %s183_s3 = inlined_call_operand.hbm [shape: f32[16,256], index: 3, kind: output, shape index: {}]  }
   0x1   :  { %11 = vsyncpa [#allocation6], 0  ;;  %s120_s12 = smov [#allocation4]   ;;  %s72_s16 = scalar_lea.hbm %s182_s2, 512 }
   0x2   :  { %s21_s13 = sshll.u32 %s120_s12, 4  ;;  %p73_p0 = scmp.ne.s32.totalorder %s182_s2, %s72_s16  ;;  %s22_s13 = int_to_ptr.vmem [resolvable:$true] %s21_s13 }
   0x3   :  { %p76_p1 = scmp.lt.u32.totalorder %s72_s16, %s182_s2 }
   0x5   :  { %p78_p2 = pnand %p76_p1, %p73_p0 }
   0x7   :  { %81 = shalt.err (!%p78_p2)
}
   0x8   :  { %s82_s21 = scalar_lea.vmem %s22_s13, 512  ;;  %p87_p4 = scmp.lt.s32.totalorder %s22_s13, %s22_s13 }
   0x9   :  { %p83_p3 = scmp.ne.s32.totalorder %s22_s13, %s82_s21  ;;  %p88_p5 = scmp.lt.s32.totalorder %s82_s21, %s82_s21 }
   0xb   :  { %p89_p6 = por %p88_p5, %p87_p4 }
   0xd   :  { %p90_p7 = pnand %p89_p6, %p83_p3 }
   0xf   :  { %93 = shalt.err (!%p90_p7)
}
  0x10   :  { %s121_s22 = smov 256   ;;  %s122_s23 = smov 16  }
  0x11   :  { %27 = dma.hbm_to_vmem [thread:$0]  %s182_s2, 512, %s22_s13, [#allocation5], %s121_s22, %s121_s22, %s122_s23  }
  0x12   :  { %116 = dma.done.wait [#allocation5], 512  }
  0x13   :  { %117 = vsyncadd [#allocation5], 4294966784  ;;  %v37_v0 = vstv %s180_s0  ;;  %v33_v1 = vld [vmem:[#allocation4] sm:$0xff]  ;;  %v42_v2 = vstv %s181_s1  ;;  %v34_v3 = vld [vmem:[#allocation4 + $0x8] sm:$0xff]  ;;  %s123_s30 = smov [#allocation7]  }
  0x14   :  { %v35_v4 = vld [vmem:[#allocation4 + $0x10] sm:$0xff]  ;;  %v38_v5 = vmul.f32 %v37_v0, %v33_v1  ;;  %v39_v6 = vmul.f32 %v37_v0, %v34_v3  ;;  %v36_v8 = vld [vmem:[#allocation4 + $0x18] sm:$0xff]  ;;  %s56_s4 = sshll.u32 %s123_s30, 4  ;;  %s57_s4 = int_to_ptr.vmem [resolvable:$true] %s56_s4 }
  0x15   :  { %v40_v7 = vmul.f32 %v37_v0, %v35_v4  ;;  %v41_v9 = vmul.f32 %v37_v0, %v36_v8  ;;  %s94_s0 = scalar_lea.vmem %s57_s4, 512  ;;  %p99_p9 = scmp.lt.s32.totalorder %s57_s4, %s57_s4 }
  0x16   :  { %v43_v10 = vadd.f32 %v42_v2, %v38_v5  ;;  %v44_v11 = vadd.f32 %v42_v2, %v39_v6  ;;  %p95_p8 = scmp.ne.s32.totalorder %s57_s4, %s94_s0  ;;  %p100_p10 = scmp.lt.s32.totalorder %s94_s0, %s94_s0 }
  0x17   :  { %v45_v12 = vadd.f32 %v42_v2, %v40_v7  ;;  %v46_v13 = vadd.f32 %v42_v2, %v41_v9 }
  0x18   :  { %47 = vst [vmem:[#allocation7] sm:$0xff] %v43_v10  ;;  %48 = vst [vmem:[#allocation7 + $0x8] sm:$0xff] %v44_v11  ;;  %p101_p11 = por %p100_p10, %p99_p9 }
  0x19   :  { %49 = vst [vmem:[#allocation7 + $0x10] sm:$0xff] %v45_v12  ;;  %50 = vst [vmem:[#allocation7 + $0x18] sm:$0xff] %v46_v13 }
  0x1a   :  { %p102_p12 = pnand %p101_p11, %p95_p8 }
  0x1c   :  { %105 = shalt.err (!%p102_p12)
}
  0x1d   :  { %s106_s5 = scalar_lea.hbm %s183_s3, 512 }
  0x1e   :  { %p107_p13 = scmp.ne.s32.totalorder %s183_s3, %s106_s5  ;;  %p110_p0 = scmp.lt.u32.totalorder %s106_s5, %s183_s3 }
  0x20   :  { %p112_p1 = pnand %p110_p0, %p107_p13 }
  0x22   :  { %115 = shalt.err (!%p112_p1)
}
  0x23   :  { %62 = dma.vmem_to_hbm [thread:$0]  %s57_s4, 512, %s183_s3, [#allocation6], %s121_s22, %s121_s22, %s122_s23  }
  0x24   :  { %118 = dma.done.wait [#allocation6], 512  }
  0x25   :  { %119 = vsyncadd [#allocation6], 4294966784 }
  0x26   :  { %66 = vsyncpa [#allocation5], 1 }
  0x27   :  { %67 = vsyncpa [#allocation6], 1 }

</bundles_post_ra>
